<compile_context>
chip_gen: v5e
topology: v5e:2x2
jax: 0.10.0
libtpu: 0.0.40
codegen_flags: <defaults>
</compile_context>

<pallas_src>
import jax
import jax.numpy as jnp
from jax.experimental import pallas as pl
from jax.experimental.pallas import tpu as pltpu

LANE = 128


def car_model_kernel(x_ref, w1_ref, b1_ref, w2_ref, b2_ref, o_ref):
    # linear1: bf16 operands on the MXU, f32 accumulation.
    h = jnp.dot(x_ref[...].astype(jnp.bfloat16), w1_ref[...],
                preferred_element_type=jnp.float32)
    h = jnp.tanh(h + b1_ref[...])  # f32 elementwise / EUP (v5e-safe)
    # TODO(synk): dropout(p=0.2) is identity in eval mode; training-mode RNG masking omitted.
    # linear2 into a lane-dense (TB, 128) tile; padded columns carry bias -1e30.
    logits = jnp.dot(h.astype(jnp.bfloat16), w2_ref[...],
                     preferred_element_type=jnp.float32) + b2_ref[...]
    # softmax over the last dim (PyTorch F.softmax dim=1 for 2D); padded cols -> exactly 0.
    m = jnp.max(logits, axis=-1, keepdims=True)
    e = jnp.exp(logits - m)
    o_ref[...] = e * pl.reciprocal(jnp.sum(e, axis=-1, keepdims=True), approx=True)


def car_model_forward(x, w1, b1, w2, b2, *, block_b=512):
    """x: [B, F_in] f32. w1: [F_in, H], b1: [1, H], w2: [H, n_out], b2: [1, n_out] (f32)."""
    B, F_in = x.shape
    H = w1.shape[1]
    n_out = w2.shape[1]
    n_out_pad = max(LANE, pl.cdiv(n_out, LANE) * LANE)

    # Lane-dense output: pad linear2 to n_out_pad columns. Padded weight cols are 0,
    # padded bias cols are -1e30, so padded softmax entries underflow to exactly 0.
    w2_pad = jnp.zeros((H, n_out_pad), jnp.float32).at[:, :n_out].set(w2)
    b2_pad = jnp.full((1, n_out_pad), -1e30, jnp.float32).at[:, :n_out].set(b2)

    # One-time host-side cast of the resident weights to bf16 (halves weight VMEM/DMA).
    w1_bf = w1.astype(jnp.bfloat16)
    w2_bf = w2_pad.astype(jnp.bfloat16)

    # Batch tile: multiple of 8 sublanes, as large as block_b; pad B up to a multiple.
    TB = min(block_b, pl.cdiv(B, 8) * 8)
    B_pad = pl.cdiv(B, TB) * TB
    if B_pad != B:
        x = jnp.pad(x, ((0, B_pad - B), (0, 0)))
    grid = (B_pad // TB,)

    cost = pl.CostEstimate(
        flops=2 * B_pad * (F_in * H + H * n_out_pad),
        transcendentals=B_pad * (H + n_out_pad),
        bytes_accessed=(4 * B_pad * (F_in + n_out_pad)
                        + 2 * (F_in * H + H * n_out_pad)
                        + 4 * (H + n_out_pad)),
    )

    out_pad = pl.pallas_call(
        car_model_kernel,
        out_shape=jax.ShapeDtypeStruct((B_pad, n_out_pad), jnp.float32),
        grid=grid,
        in_specs=[
            pl.BlockSpec((TB, F_in), lambda i: (i, 0)),       # streamed x tile
            pl.BlockSpec((F_in, H), lambda i: (0, 0)),        # resident weights
            pl.BlockSpec((1, H), lambda i: (0, 0)),
            pl.BlockSpec((H, n_out_pad), lambda i: (0, 0)),
            pl.BlockSpec((1, n_out_pad), lambda i: (0, 0)),
        ],
        out_specs=pl.BlockSpec((TB, n_out_pad), lambda i: (i, 0)),
        compiler_params=pltpu.CompilerParams(
            dimension_semantics=("parallel",)),
        cost_estimate=cost,
    )(x, w1_bf, b1, w2_bf, b2_pad)
    return out_pad[:B, :n_out]


def init_params(key, no_input, no_output, hidden=256):
    # Deterministic init mimicking PyTorch Linear's U(-1/sqrt(fan_in), +1/sqrt(fan_in)).
    k1, k2, k3, k4 = jax.random.split(key, 4)
    lim1 = 1.0 / jnp.sqrt(jnp.float32(no_input))
    lim2 = 1.0 / jnp.sqrt(jnp.float32(hidden))
    w1 = jax.random.uniform(k1, (no_input, hidden), jnp.float32, -lim1, lim1)
    b1 = jax.random.uniform(k2, (1, hidden), jnp.float32, -lim1, lim1)
    w2 = jax.random.uniform(k3, (hidden, no_output), jnp.float32, -lim2, lim2)
    b2 = jax.random.uniform(k4, (1, no_output), jnp.float32, -lim2, lim2)
    return w1, b1, w2, b2


if __name__ == "__main__":
    no_input, no_output, hidden = 32, 8, 256
    batch = 8
    key = jax.random.PRNGKey(0)
    kx, kp, kx2 = jax.random.split(key, 3)
    x = jax.random.normal(kx, (batch, no_input), jnp.float32)
    w1, b1, w2, b2 = init_params(kp, no_input, no_output, hidden)

    out = car_model_forward(x, w1, b1, w2, b2)
    jax.block_until_ready(out)

    # f32 reference (kernel uses bf16 MXU operands -> loosened tolerance).
    ref = jax.nn.softmax(jnp.tanh(x @ w1 + b1) @ w2 + b2, axis=-1)
    assert out.shape == (batch, no_output)
    assert jnp.allclose(out, ref, atol=2e-2), "mismatch vs f32 reference"
    assert jnp.allclose(jnp.sum(out, axis=-1), 1.0, atol=1e-2), "softmax rows do not sum to 1"
    assert jnp.array_equal(jnp.argmax(out, axis=-1), jnp.argmax(ref, axis=-1)), "argmax mismatch"

    # Exercise the batch grid + padding path (B not a multiple of the tile, grid > 1).
    x2 = jax.random.normal(kx2, (300, no_input), jnp.float32)
    out2 = car_model_forward(x2, w1, b1, w2, b2, block_b=128)
    jax.block_until_ready(out2)
    ref2 = jax.nn.softmax(jnp.tanh(x2 @ w1 + b1) @ w2 + b2, axis=-1)
    assert out2.shape == (300, no_output)
    assert jnp.allclose(out2, ref2, atol=2e-2), "mismatch vs f32 reference (gridded path)"

    print("KERNEL_OK")
</pallas_src>

<mosaic_0001>
module attributes {stable_mosaic.version = 11 : i64} {
  func.func @car_model_kernel(%arg0: i32, %arg1: memref<8x32xf32, #tpu.memory_space<vmem>>, %arg2: memref<32x256xbf16, #tpu.memory_space<vmem>>, %arg3: memref<1x256xf32, #tpu.memory_space<vmem>>, %arg4: memref<256x128xbf16, #tpu.memory_space<vmem>>, %arg5: memref<1x128xf32, #tpu.memory_space<vmem>>, %arg6: memref<8x128xf32, #tpu.memory_space<vmem>>) attributes {dimension_semantics = [#tpu.dimension_semantics<parallel>], iteration_bounds = array<i64: 1>, scalar_prefetch = 0 : i64, scratch_operands = 0 : i64, tpu.core_type = #tpu.core_type<tc>, window_params = [{transform_indices = @transform_0, window_bounds = array<i64: 8, 32>}, {pipeline_mode = #tpu.pipeline_mode<synchronous>, transform_indices = @transform_1, window_bounds = array<i64: 32, 256>}, {pipeline_mode = #tpu.pipeline_mode<synchronous>, transform_indices = @transform_2, window_bounds = array<i64: 1, 256>}, {pipeline_mode = #tpu.pipeline_mode<synchronous>, transform_indices = @transform_3, window_bounds = array<i64: 256, 128>}, {pipeline_mode = #tpu.pipeline_mode<synchronous>, transform_indices = @transform_4, window_bounds = array<i64: 1, 128>}, {transform_indices = @transform_5, window_bounds = array<i64: 8, 128>}]} {
    %c0 = arith.constant 0 : index
    %c0_0 = arith.constant 0 : index
    %0 = vector.load %arg1[%c0, %c0_0] : memref<8x32xf32, #tpu.memory_space<vmem>>, vector<8x32xf32>
    %1 = arith.truncf %0 : vector<8x32xf32> to vector<8x32xbf16>
    %c0_1 = arith.constant 0 : index
    %c0_2 = arith.constant 0 : index
    %2 = vector.load %arg2[%c0_1, %c0_2] : memref<32x256xbf16, #tpu.memory_space<vmem>>, vector<32x256xbf16>
    %cst = arith.constant dense<0.000000e+00> : vector<8x256xf32>
    %3 = tpu.matmul %1, %2, %cst {dimension_numbers = #tpu.dot_dimension_numbers<[1], [0], [0], [1], [0, 0, 1, 1], [], []>} : vector<8x32xbf16>, vector<32x256xbf16>, vector<8x256xf32> -> vector<8x256xf32>
    %c0_3 = arith.constant 0 : index
    %c0_4 = arith.constant 0 : index
    %4 = vector.load %arg3[%c0_3, %c0_4] : memref<1x256xf32, #tpu.memory_space<vmem>>, vector<1x256xf32>
    %5 = vector.broadcast %4 : vector<1x256xf32> to vector<8x256xf32>
    %6 = arith.addf %3, %5 : vector<8x256xf32>
    %7 = math.tanh %6 : vector<8x256xf32>
    %8 = arith.truncf %7 : vector<8x256xf32> to vector<8x256xbf16>
    %c0_5 = arith.constant 0 : index
    %c0_6 = arith.constant 0 : index
    %9 = vector.load %arg4[%c0_5, %c0_6] : memref<256x128xbf16, #tpu.memory_space<vmem>>, vector<256x128xbf16>
    %cst_7 = arith.constant dense<0.000000e+00> : vector<8x128xf32>
    %10 = tpu.matmul %8, %9, %cst_7 {dimension_numbers = #tpu.dot_dimension_numbers<[1], [0], [0], [1], [0, 0, 1, 1], [], []>} : vector<8x256xbf16>, vector<256x128xbf16>, vector<8x128xf32> -> vector<8x128xf32>
    %c0_8 = arith.constant 0 : index
    %c0_9 = arith.constant 0 : index
    %11 = vector.load %arg5[%c0_8, %c0_9] : memref<1x128xf32, #tpu.memory_space<vmem>>, vector<1x128xf32>
    %12 = vector.broadcast %11 : vector<1x128xf32> to vector<8x128xf32>
    %13 = arith.addf %10, %12 : vector<8x128xf32>
    %cst_10 = arith.constant dense<0xFF800000> : vector<8xf32>
    %14 = vector.multi_reduction <maximumf>, %13, %cst_10 [1] : vector<8x128xf32> to vector<8xf32>
    %15 = vector.shape_cast %14 : vector<8xf32> to vector<8x1xf32>
    %16 = vector.broadcast %15 : vector<8x1xf32> to vector<8x128xf32>
    %17 = arith.subf %13, %16 : vector<8x128xf32>
    %18 = math.exp %17 : vector<8x128xf32>
    %cst_11 = arith.constant dense<0.000000e+00> : vector<8xf32>
    %19 = vector.multi_reduction <add>, %18, %cst_11 [1] : vector<8x128xf32> to vector<8xf32>
    %20 = vector.shape_cast %19 : vector<8xf32> to vector<8x1xf32>
    %21 = tpu.reciprocal %20 {approx = true} : vector<8x1xf32> -> vector<8x1xf32>
    %22 = vector.broadcast %21 : vector<8x1xf32> to vector<8x128xf32>
    %23 = arith.mulf %18, %22 : vector<8x128xf32>
    %c0_12 = arith.constant 0 : index
    %c0_13 = arith.constant 0 : index
    %24 = vector.load %arg6[%c0_12, %c0_13] : memref<8x128xf32, #tpu.memory_space<vmem>>, vector<8x128xf32>
    tpu.vector_store %arg6[%c0_12, %c0_13], %23 {strides = array<i32>} : memref<8x128xf32, #tpu.memory_space<vmem>>, vector<8x128xf32>,
    return
  }
  func.func @transform_0(%arg0: i32) -> (i32, i32) {
    %c0_i32 = arith.constant 0 : i32
    %c0_i32_0 = arith.constant 0 : i32
    return %arg0, %c0_i32 : i32, i32
  }
  func.func @transform_1(%arg0: i32) -> (i32, i32) {
    %c0_i32 = arith.constant 0 : i32
    %c0_i32_0 = arith.constant 0 : i32
    %c0_i32_1 = arith.constant 0 : i32
    return %c0_i32, %c0_i32_0 : i32, i32
  }
  func.func @transform_2(%arg0: i32) -> (i32, i32) {
    %c0_i32 = arith.constant 0 : i32
    %c0_i32_0 = arith.constant 0 : i32
    %c0_i32_1 = arith.constant 0 : i32
    return %c0_i32, %c0_i32_0 : i32, i32
  }
  func.func @transform_3(%arg0: i32) -> (i32, i32) {
    %c0_i32 = arith.constant 0 : i32
    %c0_i32_0 = arith.constant 0 : i32
    %c0_i32_1 = arith.constant 0 : i32
    return %c0_i32, %c0_i32_0 : i32, i32
  }
  func.func @transform_4(%arg0: i32) -> (i32, i32) {
    %c0_i32 = arith.constant 0 : i32
    %c0_i32_0 = arith.constant 0 : i32
    %c0_i32_1 = arith.constant 0 : i32
    return %c0_i32, %c0_i32_0 : i32, i32
  }
  func.func @transform_5(%arg0: i32) -> (i32, i32) {
    %c0_i32 = arith.constant 0 : i32
    %c0_i32_0 = arith.constant 0 : i32
    return %arg0, %c0_i32 : i32, i32
  }
}

</mosaic_0001>

<bundles_post_ra>
// kernel: tpu_custom_call.1
= control target key start
LH: loop header
LB: loop body
LE: loop exit
PB: predicated region body
PF: predicated region fallthrough
CT: control target
= control target key end

     0   :  { %10 = vsyncpa [#allocation3], 0  ;;  %s639_s0 = inlined_call_operand.hbm [shape: f32[8,32], index: 0, kind: input, shape index: {}]   ;;  %s640_s1 = inlined_call_operand.hbm [shape: bf16[32,256], index: 1, kind: input, shape index: {}]   ;;  %s641_s2 = inlined_call_operand.hbm [shape: f32[1,256], index: 2, kind: input, shape index: {}]   ;;  %s642_s3 = inlined_call_operand.hbm [shape: bf16[256,128], index: 3, kind: input, shape index: {}]   ;;  %s643_s4 = inlined_call_operand.vmem [shape: f32[1,128], index: 4, kind: input, shape index: {}]   ;;  %s644_s5 = inlined_call_operand.hbm [shape: f32[8,128], index: 5, kind: output, shape index: {}]  }
   0x1   :  { %11 = vsyncpa [#allocation6], 0 }
   0x2   :  { %12 = vsyncpa [#allocation9], 0  ;;  %s29_s20 = sshll.u32 %s640_s1, 4  ;;  %s30_s20 = int_to_ptr.hbm [resolvable:$true] %s29_s20 }
   0x3   :  { %13 = vsyncpa [#allocation4], 0  ;;  %s582_s21 = smov [#allocation5]   ;;  %s19_s25 = sshll.u32 %s639_s0, 4  ;;  %s20_s25 = int_to_ptr.hbm [resolvable:$true] %s19_s25 }
   0x4   :  { %s31_s22 = sshll.u32 %s582_s21, 4  ;;  %s583_s26 = smov 128   ;;  %s32_s22 = int_to_ptr.vmem [resolvable:$true] %s31_s22 }
   0x5   :  { %s584_s27 = smov 8   ;;  %s585_s28 = smov [#allocation2]  }
   0x6   :  { %37 = dma.hbm_to_vmem [thread:$0]  %s30_s20, 512, %s32_s22, [#allocation6], %s583_s26, %s583_s26, %s584_s27  }
   0x7   :  { %s21_s29 = sshll.u32 %s585_s28, 4  ;;  %s43_s7 = sshll.u32 %s641_s2, 4  ;;  %s22_s29 = int_to_ptr.vmem [resolvable:$true] %s21_s29  ;;  %s44_s7 = int_to_ptr.hbm [resolvable:$true] %s43_s7 }
   0x8   :  { %24 = dma.hbm_to_vmem [thread:$0]  %s20_s25, 128, %s22_s29, [#allocation3]  }
   0x9   :  { %s53_s9 = sshll.u32 %s642_s3, 4  ;;  %s586_s10 = smov [#allocation7]   ;;  %s54_s9 = int_to_ptr.hbm [resolvable:$true] %s53_s9 }
   0xa   :  { %s45_s11 = sshll.u32 %s586_s10, 4  ;;  %s587_s0 = smov [#allocation8]   ;;  %s46_s11 = int_to_ptr.vmem [resolvable:$true] %s45_s11 }
   0xb   :  { %48 = dma.hbm_to_vmem [thread:$0]  %s44_s7, 32, %s46_s11, [#allocation6]  }
   0xc   :  { %s55_s12 = sshll.u32 %s587_s0, 4  ;;  %s588_s13 = smov 64   ;;  %s56_s12 = int_to_ptr.vmem [resolvable:$true] %s55_s12 }
   0xd   :  { %s589_s14 = smov 4  }
   0xe   :  { %61 = dma.hbm_to_vmem [thread:$0]  %s54_s9, 2048, %s56_s12, [#allocation9], %s588_s13, %s588_s13, %s589_s14  }
   0xf   :  { %574 = dma.done.wait [#allocation3], 128  }
  0x10   :  { %575 = vsyncadd [#allocation3], 4294967168 }
  0x11   :  { %576 = dma.done.wait [#allocation6], 544  }
  0x12   :  { %577 = vsyncadd [#allocation6], 4294966752 }
  0x13   :  { %578 = dma.done.wait [#allocation9], 2048  }
  0x14   :  { %579 = vsyncadd [#allocation9], 4294965248  ;;  %v344_v0 = vld [vmem:[#allocation5 + $0x10] sm:$0xf]  ;;  %v419_v1 = vld [vmem:[#allocation5 + $0x14] sm:$0xf0] }
  0x15   :  { %v418_v2 = vld [vmem:[#allocation5 + $0x14] sm:$0xf]  ;;  %v345_v3 = vor.u32 %v419_v1, %v344_v0  ;;  %v346_v4 = vld [vmem:[#allocation5 + $0x18] sm:$0xf0]  ;;  %v336_v5 = vld [vmem:[#allocation5] sm:$0xf] }
  0x16   :  { %v417_v6 = vld [vmem:[#allocation5 + $0x4] sm:$0xf0]  ;;  %v349_v7 = vor.u32 %v418_v2, %v346_v4  ;;  %v416_v8 = vld [vmem:[#allocation5 + $0x4] sm:$0xf]  ;;  %v338_v9 = vld [vmem:[#allocation5 + $0x8] sm:$0xf0] }
  0x17   :  { %123 = vmatpush.bf16.msra.mxu0 %v345_v3  ;;  %v337_v10 = vor.u32 %v417_v6, %v336_v5  ;;  %v81_v11 = vld [vmem:[#allocation2] sm:$0xff]  ;;  %v341_v14 = vor.u32 %v416_v8, %v338_v9  ;;  %vm113_vm0 = vcmask 261120   ;;  %v425_v18 = vld [vmem:[#allocation8 + $0x28] sm:$0xff]  ;;  %v424_v20 = vld [vmem:[#allocation8 + $0x20] sm:$0xff]  ;;  %s590_s15 = smov [#allocation10]  }
  0x18   :  { %v427_v12 = vld [vmem:[#allocation8 + $0x38] sm:$0xff]  ;;  %136 = vmatpush.bf16.msra.mxu1 %v349_v7  ;;  %v426_v15 = vld [vmem:[#allocation8 + $0x30] sm:$0xff]  ;;  %v82_v17 = vpack.c.bf16 %v81_v11, %v81_v11  ;;  %v433_v19 = vld [vmem:[#allocation8 + $0x68] sm:$0xff]  ;;  %s320_s16 = sshll.u32 %s590_s15, 4  ;;  %s321_s16 = int_to_ptr.vmem [resolvable:$true] %s320_s16 }
  0x19   :  { %v435_v13 = vld [vmem:[#allocation8 + $0x78] sm:$0xff]  ;;  %279 = vmatpush.bf16.msra.mxu2 %v427_v12  ;;  %v434_v16 = vld [vmem:[#allocation8 + $0x70] sm:$0xff]  ;;  %v432_v21 = vld [vmem:[#allocation8 + $0x60] sm:$0xff] }
  0x1a   :  { %292 = vmatpush.bf16.msra.mxu3 %v435_v13  ;;  %v423_v22 = vld [vmem:[#allocation8 + $0x18] sm:$0xff]  ;;  %v422_v24 = vld [vmem:[#allocation8 + $0x10] sm:$0xff]  ;;  %v421_v26 = vld [vmem:[#allocation8 + $0x8] sm:$0xff] }
  0x1b   :  { %124 = vmatpush.bf16.msra.mxu0 %v337_v10  ;;  %v431_v23 = vld [vmem:[#allocation8 + $0x58] sm:$0xff]  ;;  %v430_v25 = vld [vmem:[#allocation8 + $0x50] sm:$0xff]  ;;  %v429_v27 = vld [vmem:[#allocation8 + $0x48] sm:$0xff] }
  0x1c   :  { %137 = vmatpush.bf16.msra.mxu1 %v341_v14  ;;  %v420_v28 = vld [vmem:[#allocation8] sm:$0xff]  ;;  %v87_v30 = vld [vmem:[#allocation7] sm:$0x3]  ;;  %v445_v43 = vld [vmem:[%s643_s4] ss:$0 sm:$0xff]  ;;  %s322_s4 = sshll.u32 %s644_s5, 4  ;;  %s323_s4 = int_to_ptr.hbm [resolvable:$true] %s322_s4 }
  0x1d   :  { %280 = vmatpush.bf16.msra.mxu2 %v426_v15  ;;  %v428_v29 = vld [vmem:[#allocation8 + $0x40] sm:$0xff]  ;;  %v89_v31 = vperm.slane %v87_v30, 0  ;;  %v90_v32 = vperm.slane %v87_v30, 1 }
  0x1e   :  { %293 = vmatpush.bf16.msra.mxu3 %v434_v16  ;;  %350 = vmatmul.msk.bf16.vlgmr.msra.gmra.mxu0 %vm113_vm0, %v82_v17 }
  0x1f   :  { %351 = vmatmul.msk.bf16.vlgmr.msra.gmra.mxu1 %vm113_vm0, %v82_v17 }
  0x21   :  { %281 = vmatpush.bf16.msra.mxu2 %v425_v18 }
  0x22   :  { %294 = vmatpush.bf16.msra.mxu3 %v433_v19 }
  0x25   :  { %282 = vmatpush.bf16.msra.mxu2 %v424_v20 }
  0x26   :  { %295 = vmatpush.bf16.msra.mxu3 %v432_v21 }
  0x29   :  { %283 = vmatpush.bf16.msra.mxu2 %v423_v22 }
  0x2a   :  { %296 = vmatpush.bf16.msra.mxu3 %v431_v23 }
  0x2d   :  { %284 = vmatpush.bf16.msra.mxu2 %v422_v24 }
  0x2e   :  { %297 = vmatpush.bf16.msra.mxu3 %v430_v25 }
  0x31   :  { %285 = vmatpush.bf16.msra.mxu2 %v421_v26 }
  0x32   :  { %298 = vmatpush.bf16.msra.mxu3 %v429_v27 }
  0x35   :  { %286 = vmatpush.bf16.msra.mxu2 %v420_v28 }
  0x36   :  { %299 = vmatpush.bf16.msra.mxu3 %v428_v29 }
  0x9b   :  { %v126_v33 = vpop.f32.mrf.mxu0 }
  0x9c   :  { %v127_v34 = vadd.f32 %v126_v33, %v89_v31  ;;  %v139_v35 = vpop.f32.mrf.mxu1 }
  0x9d   :  { %v140_v36 = vadd.f32 %v139_v35, %v90_v32 }
  0x9e   :  { %446 = vtanh.f32 %v127_v34 }
  0x9f   :  { %448 = vtanh.f32 %v140_v36 }
  0xa3   :  { %v128_v37 = vpop.f32.mrf.mxu0 }
  0xa4   :  { %v447_v38 = vpop.eup %446  ;;  %v141_v39 = vpop.f32.mrf.mxu1 }
  0xa5   :  { %v449_v40 = vpop.eup %448  ;;  %v145_v41 = vpack.c.bf16 %v447_v38, %v447_v38 }
  0xa6   :  { %v146_v42 = vpack.c.bf16 %v449_v40, %v449_v40 }
  0xa7   :  { %287 = vmatmul.bf16.vlgmr.msra.gmra.mxu2 %v145_v41 }
  0xa8   :  { %300 = vmatmul.bf16.vlgmr.msra.gmra.mxu3 %v146_v42 }
 0x12a   :  { %v288_v44 = vpop.f32.mrf.mxu2 }
 0x12b   :  { %v289_v45 = vadd.f32 %v445_v43, %v288_v44  ;;  %v301_v46 = vpop.f32.mrf.mxu3 }
 0x12d   :  { %v302_v47 = vadd.f32 %v301_v46, %v289_v45 }
 0x12f   :  { %305 = vmax.xlane.f32.xlu0 %v302_v47 }
 0x132   :  { %v290_v48 = vpop.f32.mrf.mxu2 }
 0x133   :  { %v303_v49 = vpop.f32.mrf.mxu3 }
 0x1a2   :  { %v306_v50 = vpop.xlane.xlu0 %305 }
 0x1a3   :  { %v307_v51 = vsub.f32 %v302_v47, %v306_v50 }
 0x1a5   :  { %v308_v52 = vmul.f32 1.442695, %v307_v51 }
 0x1a7   :  { %450 = vpow2.f32 %v308_v52 }
 0x1ad   :  { %v451_v53 = vpop.eup %450 }
 0x1ae   :  { %310 = vadd.xlane.f32.xlu0 %v451_v53 }
 0x221   :  { %v311_v54 = vpop.xlane.xlu0 %310 }
 0x222   :  { %452 = vrcp.f32 %v311_v54 }
 0x228   :  { %v453_v55 = vpop.eup %452 }
 0x229   :  { %v313_v56 = vmul.f32 %v453_v55, %v451_v53 }
 0x22b   :  { %314 = vst [vmem:[#allocation10] sm:$0xff] %v313_v56 }
 0x22c   :  { %325 = dma.vmem_to_hbm [thread:$0]  %s321_s16, 128, %s323_s4, [#allocation4]  }
 0x22d   :  { %580 = dma.done.wait [#allocation4], 128  }
 0x22e   :  { %581 = vsyncadd [#allocation4], 4294967168 }
 0x22f   :  { %330 = vsyncpa [#allocation3], 1 }
 0x230   :  { %331 = vsyncpa [#allocation6], 1 }
 0x231   :  { %332 = vsyncpa [#allocation9], 1 }
 0x232   :  { %333 = vsyncpa [#allocation4], 1 }

</bundles_post_ra>
